<compile_context>
chip_gen: v7x
topology: tpu7x:2x2x1
jax: 0.10.0
libtpu: 0.0.40
codegen_flags: <defaults>
</compile_context>

<pallas_src>
import jax
import jax.numpy as jnp
from jax.experimental import pallas as pl
from jax.experimental.pallas import tpu as pltpu


def _round_up(x, m):
    return (x + m - 1) // m * m


# ---------------------------------------------------------------------------
# Kernel: normalization already folded into (w1, b1).  Weights bf16, biases f32.
# ---------------------------------------------------------------------------
def expert_policy_kernel(x_ref, w1_ref, b1_ref, w2_ref, b2_ref, wo_ref, bo_ref,
                         o_ref):
    x = x_ref[...]                                            # (TM, OBS) f32
    # Hidden layer 1 (+ folded obs-norm) + tanh
    h = jnp.dot(x.astype(jnp.bfloat16), w1_ref[...],
                preferred_element_type=jnp.float32) + b1_ref[...]
    h = jnp.tanh(h)
    # Hidden layer 2 + tanh
    h = jnp.dot(h.astype(jnp.bfloat16), w2_ref[...],
                preferred_element_type=jnp.float32) + b2_ref[...]
    h = jnp.tanh(h)
    # Output layer (no nonlinearity); padded output columns are zero weights.
    o_ref[...] = jnp.dot(h.astype(jnp.bfloat16), wo_ref[...],
                         preferred_element_type=jnp.float32) + bo_ref[...]


# ---------------------------------------------------------------------------
# One-time parameter preparation: fold normalization, pad to 128 lanes, cast.
# ---------------------------------------------------------------------------
def prepare_kernel_params(p):
    inv_std = 1.0 / (p["std"] + 1e-6)                         # (1, obs)
    # Fold (x - mean) * inv_std into layer 1 (exact for affine norm + Linear).
    w1f = p["w1"] * inv_std[0][:, None]                       # (obs, hid)
    b1f = p["b1"] - (p["mean"] * inv_std) @ p["w1"]           # (1, hid)

    obs = w1f.shape[0]
    hid = w1f.shape[1]
    act = p["wo"].shape[1]
    hid_pad = _round_up(hid, 128)
    act_pad = _round_up(act, 128)

    w1p = jnp.zeros((obs, hid_pad), jnp.float32).at[:, :hid].set(w1f)
    b1p = jnp.zeros((1, hid_pad), jnp.float32).at[:, :hid].set(b1f)
    w2p = jnp.zeros((hid_pad, hid_pad), jnp.float32).at[:hid, :hid].set(p["w2"])
    b2p = jnp.zeros((1, hid_pad), jnp.float32).at[:, :hid].set(p["b2"])
    wop = jnp.zeros((hid_pad, act_pad), jnp.float32).at[:hid, :act].set(p["wo"])
    bop = jnp.zeros((1, act_pad), jnp.float32).at[:, :act].set(p["bo"])

    return {
        "w1": w1p.astype(jnp.bfloat16), "b1": b1p,
        "w2": w2p.astype(jnp.bfloat16), "b2": b2p,
        "wo": wop.astype(jnp.bfloat16), "bo": bop,
        "act_dim": act,
    }


# ---------------------------------------------------------------------------
# Wrapper: 1-D grid over batch, resident weights, lane-dense padded output.
# ---------------------------------------------------------------------------
def expert_policy_forward(observ, kp, *, tm=256):
    B, obs_dim = observ.shape
    hid_pad = kp["w1"].shape[1]
    act_pad = kp["wo"].shape[1]
    act_dim = kp["act_dim"]

    # Batch tile: multiple of 8 sublanes; shrink for tiny batches, pad B to tile.
    tm = min(tm, _round_up(B, 8))
    B_pad = _round_up(B, tm)
    if B_pad != B:
        observ = jnp.pad(observ, ((0, B_pad - B), (0, 0)))
    grid = (pl.cdiv(B_pad, tm),)

    out_padded = pl.pallas_call(
        expert_policy_kernel,
        out_shape=jax.ShapeDtypeStruct((B_pad, act_pad), jnp.float32),
        grid=grid,
        in_specs=[
            pl.BlockSpec((tm, obs_dim), lambda i: (i, 0)),        # obs tile
            pl.BlockSpec((obs_dim, hid_pad), lambda i: (0, 0)),   # w1 (resident)
            pl.BlockSpec((1, hid_pad), lambda i: (0, 0)),         # b1
            pl.BlockSpec((hid_pad, hid_pad), lambda i: (0, 0)),   # w2
            pl.BlockSpec((1, hid_pad), lambda i: (0, 0)),         # b2
            pl.BlockSpec((hid_pad, act_pad), lambda i: (0, 0)),   # wo
            pl.BlockSpec((1, act_pad), lambda i: (0, 0)),         # bo
        ],
        out_specs=pl.BlockSpec((tm, act_pad), lambda i: (i, 0)),
        compiler_params=pltpu.CompilerParams(
            dimension_semantics=("parallel",),
            vmem_limit_bytes=32 * 1024 * 1024,
        ),
    )(observ, kp["w1"], kp["b1"], kp["w2"], kp["b2"], kp["wo"], kp["bo"])

    return out_padded[:B, :act_dim]


# ---------------------------------------------------------------------------
# Synthetic parameters (shapes implied by ExpertPolicy.__init__) + f32 reference.
# ---------------------------------------------------------------------------
def init_params(key, obs_dim, hidden_dim, act_dim):
    ks = jax.random.split(key, 8)
    scale = 0.1
    mean = jax.random.normal(ks[0], (1, obs_dim), jnp.float32)
    meansq = mean ** 2 + jax.random.uniform(ks[1], (1, obs_dim), jnp.float32)
    std = jnp.sqrt(jnp.maximum(0.0, meansq - mean ** 2))
    return {
        "mean": mean,
        "std": std,
        "w1": scale * jax.random.normal(ks[2], (obs_dim, hidden_dim), jnp.float32),
        "b1": scale * jax.random.normal(ks[3], (1, hidden_dim), jnp.float32),
        "w2": scale * jax.random.normal(ks[4], (hidden_dim, hidden_dim), jnp.float32),
        "b2": scale * jax.random.normal(ks[5], (1, hidden_dim), jnp.float32),
        "wo": scale * jax.random.normal(ks[6], (hidden_dim, act_dim), jnp.float32),
        "bo": scale * jax.random.normal(ks[7], (1, act_dim), jnp.float32),
    }


def reference_forward(observ, p):
    h = (observ - p["mean"]) / (p["std"] + 1e-6)
    h = jnp.tanh(h @ p["w1"] + p["b1"])
    h = jnp.tanh(h @ p["w2"] + p["b2"])
    return h @ p["wo"] + p["bo"]


if __name__ == "__main__":
    # TODO(synk): pickle policy-file loading / get_action numpy plumbing is host-side
    # setup with no Pallas equivalent; synthetic params stand in for the loaded file.
    key = jax.random.PRNGKey(0)
    k_obs, k_par = jax.random.split(key)

    B, OBS, HID, ACT = 8, 32, 64, 8
    observ = jax.random.normal(k_obs, (B, OBS), jnp.float32)
    params = init_params(k_par, OBS, HID, ACT)
    kparams = prepare_kernel_params(params)

    out = expert_policy_forward(observ, kparams)
    out = jax.block_until_ready(out)

    ref = reference_forward(observ, params)
    assert out.shape == (B, ACT)
    # bf16 MXU operands (f32 accumulate) -> slightly looser tolerance vs f32 reference.
    assert jnp.allclose(out, ref, atol=3e-2, rtol=3e-2), \
        float(jnp.max(jnp.abs(out - ref)))

    print("KERNEL_OK")
</pallas_src>

<mosaic_0001>
module attributes {stable_mosaic.version = 11 : i64} {
  func.func @expert_policy_kernel(%arg0: i32, %arg1: memref<8x32xf32, #tpu.memory_space<vmem>>, %arg2: memref<32x128xbf16, #tpu.memory_space<vmem>>, %arg3: memref<1x128xf32, #tpu.memory_space<vmem>>, %arg4: memref<128x128xbf16, #tpu.memory_space<vmem>>, %arg5: memref<1x128xf32, #tpu.memory_space<vmem>>, %arg6: memref<128x128xbf16, #tpu.memory_space<vmem>>, %arg7: memref<1x128xf32, #tpu.memory_space<vmem>>, %arg8: memref<8x128xf32, #tpu.memory_space<vmem>>) attributes {dimension_semantics = [#tpu.dimension_semantics<parallel>], iteration_bounds = array<i64: 1>, scalar_prefetch = 0 : i64, scratch_operands = 0 : i64, tpu.core_type = #tpu.core_type<tc>, window_params = [{transform_indices = @transform_0, window_bounds = array<i64: 8, 32>}, {pipeline_mode = #tpu.pipeline_mode<synchronous>, transform_indices = @transform_1, window_bounds = array<i64: 32, 128>}, {pipeline_mode = #tpu.pipeline_mode<synchronous>, transform_indices = @transform_2, window_bounds = array<i64: 1, 128>}, {pipeline_mode = #tpu.pipeline_mode<synchronous>, transform_indices = @transform_3, window_bounds = array<i64: 128, 128>}, {pipeline_mode = #tpu.pipeline_mode<synchronous>, transform_indices = @transform_4, window_bounds = array<i64: 1, 128>}, {pipeline_mode = #tpu.pipeline_mode<synchronous>, transform_indices = @transform_5, window_bounds = array<i64: 128, 128>}, {pipeline_mode = #tpu.pipeline_mode<synchronous>, transform_indices = @transform_6, window_bounds = array<i64: 1, 128>}, {transform_indices = @transform_7, window_bounds = array<i64: 8, 128>}]} {
    %c0 = arith.constant 0 : index
    %c0_0 = arith.constant 0 : index
    %0 = vector.load %arg1[%c0, %c0_0] : memref<8x32xf32, #tpu.memory_space<vmem>>, vector<8x32xf32>
    %1 = arith.truncf %0 : vector<8x32xf32> to vector<8x32xbf16>
    %c0_1 = arith.constant 0 : index
    %c0_2 = arith.constant 0 : index
    %2 = vector.load %arg2[%c0_1, %c0_2] : memref<32x128xbf16, #tpu.memory_space<vmem>>, vector<32x128xbf16>
    %cst = arith.constant dense<0.000000e+00> : vector<8x128xf32>
    %3 = tpu.matmul %1, %2, %cst {dimension_numbers = #tpu.dot_dimension_numbers<[1], [0], [0], [1], [0, 0, 1, 1], [], []>} : vector<8x32xbf16>, vector<32x128xbf16>, vector<8x128xf32> -> vector<8x128xf32>
    %c0_3 = arith.constant 0 : index
    %c0_4 = arith.constant 0 : index
    %4 = vector.load %arg3[%c0_3, %c0_4] : memref<1x128xf32, #tpu.memory_space<vmem>>, vector<1x128xf32>
    %5 = vector.broadcast %4 : vector<1x128xf32> to vector<8x128xf32>
    %6 = arith.addf %3, %5 : vector<8x128xf32>
    %7 = math.tanh %6 : vector<8x128xf32>
    %8 = arith.truncf %7 : vector<8x128xf32> to vector<8x128xbf16>
    %c0_5 = arith.constant 0 : index
    %c0_6 = arith.constant 0 : index
    %9 = vector.load %arg4[%c0_5, %c0_6] : memref<128x128xbf16, #tpu.memory_space<vmem>>, vector<128x128xbf16>
    %cst_7 = arith.constant dense<0.000000e+00> : vector<8x128xf32>
    %10 = tpu.matmul %8, %9, %cst_7 {dimension_numbers = #tpu.dot_dimension_numbers<[1], [0], [0], [1], [0, 0, 1, 1], [], []>} : vector<8x128xbf16>, vector<128x128xbf16>, vector<8x128xf32> -> vector<8x128xf32>
    %c0_8 = arith.constant 0 : index
    %c0_9 = arith.constant 0 : index
    %11 = vector.load %arg5[%c0_8, %c0_9] : memref<1x128xf32, #tpu.memory_space<vmem>>, vector<1x128xf32>
    %12 = vector.broadcast %11 : vector<1x128xf32> to vector<8x128xf32>
    %13 = arith.addf %10, %12 : vector<8x128xf32>
    %14 = math.tanh %13 : vector<8x128xf32>
    %15 = arith.truncf %14 : vector<8x128xf32> to vector<8x128xbf16>
    %c0_10 = arith.constant 0 : index
    %c0_11 = arith.constant 0 : index
    %16 = vector.load %arg6[%c0_10, %c0_11] : memref<128x128xbf16, #tpu.memory_space<vmem>>, vector<128x128xbf16>
    %cst_12 = arith.constant dense<0.000000e+00> : vector<8x128xf32>
    %17 = tpu.matmul %15, %16, %cst_12 {dimension_numbers = #tpu.dot_dimension_numbers<[1], [0], [0], [1], [0, 0, 1, 1], [], []>} : vector<8x128xbf16>, vector<128x128xbf16>, vector<8x128xf32> -> vector<8x128xf32>
    %c0_13 = arith.constant 0 : index
    %c0_14 = arith.constant 0 : index
    %18 = vector.load %arg7[%c0_13, %c0_14] : memref<1x128xf32, #tpu.memory_space<vmem>>, vector<1x128xf32>
    %19 = vector.broadcast %18 : vector<1x128xf32> to vector<8x128xf32>
    %20 = arith.addf %17, %19 : vector<8x128xf32>
    %c0_15 = arith.constant 0 : index
    %c0_16 = arith.constant 0 : index
    %21 = vector.load %arg8[%c0_15, %c0_16] : memref<8x128xf32, #tpu.memory_space<vmem>>, vector<8x128xf32>
    tpu.vector_store %arg8[%c0_15, %c0_16], %20 {strides = array<i32>} : memref<8x128xf32, #tpu.memory_space<vmem>>, vector<8x128xf32>,
    return
  }
  func.func @transform_0(%arg0: i32) -> (i32, i32) {
    %c0_i32 = arith.constant 0 : i32
    %c0_i32_0 = arith.constant 0 : i32
    return %arg0, %c0_i32 : i32, i32
  }
  func.func @transform_1(%arg0: i32) -> (i32, i32) {
    %c0_i32 = arith.constant 0 : i32
    %c0_i32_0 = arith.constant 0 : i32
    %c0_i32_1 = arith.constant 0 : i32
    return %c0_i32, %c0_i32_0 : i32, i32
  }
  func.func @transform_2(%arg0: i32) -> (i32, i32) {
    %c0_i32 = arith.constant 0 : i32
    %c0_i32_0 = arith.constant 0 : i32
    %c0_i32_1 = arith.constant 0 : i32
    return %c0_i32, %c0_i32_0 : i32, i32
  }
  func.func @transform_3(%arg0: i32) -> (i32, i32) {
    %c0_i32 = arith.constant 0 : i32
    %c0_i32_0 = arith.constant 0 : i32
    %c0_i32_1 = arith.constant 0 : i32
    return %c0_i32, %c0_i32_0 : i32, i32
  }
  func.func @transform_4(%arg0: i32) -> (i32, i32) {
    %c0_i32 = arith.constant 0 : i32
    %c0_i32_0 = arith.constant 0 : i32
    %c0_i32_1 = arith.constant 0 : i32
    return %c0_i32, %c0_i32_0 : i32, i32
  }
  func.func @transform_5(%arg0: i32) -> (i32, i32) {
    %c0_i32 = arith.constant 0 : i32
    %c0_i32_0 = arith.constant 0 : i32
    %c0_i32_1 = arith.constant 0 : i32
    return %c0_i32, %c0_i32_0 : i32, i32
  }
  func.func @transform_6(%arg0: i32) -> (i32, i32) {
    %c0_i32 = arith.constant 0 : i32
    %c0_i32_0 = arith.constant 0 : i32
    %c0_i32_1 = arith.constant 0 : i32
    return %c0_i32, %c0_i32_0 : i32, i32
  }
  func.func @transform_7(%arg0: i32) -> (i32, i32) {
    %c0_i32 = arith.constant 0 : i32
    %c0_i32_0 = arith.constant 0 : i32
    return %arg0, %c0_i32 : i32, i32
  }
}

</mosaic_0001>

<bundles_post_ra>
// kernel: tpu_custom_call.1
= control target key start
LH: loop header
LB: loop body
LE: loop exit
PB: predicated region body
PF: predicated region fallthrough
CT: control target
= control target key end

     0   :  { %12 = vsyncpa [#allocation3], 0  ;;  %s785_s0 = inlined_call_operand.hbm [shape: f32[8,32], index: 0, kind: input, shape index: {}]   ;;  %s786_s1 = inlined_call_operand.hbm [shape: bf16[32,128], index: 1, kind: input, shape index: {}]   ;;  %s787_s2 = inlined_call_operand.vmem [shape: f32[1,128], index: 2, kind: input, shape index: {}]   ;;  %s788_s3 = inlined_call_operand.hbm [shape: bf16[128,128], index: 3, kind: input, shape index: {}]   ;;  %s789_s4 = inlined_call_operand.vmem [shape: f32[1,128], index: 4, kind: input, shape index: {}]   ;;  %s790_s5 = inlined_call_operand.hbm [shape: bf16[128,128], index: 5, kind: input, shape index: {}]   ;;  %s791_s6 = inlined_call_operand.vmem [shape: f32[1,128], index: 6, kind: input, shape index: {}]   ;;  %s792_s7 = inlined_call_operand.hbm [shape: f32[8,128], index: 7, kind: output, shape index: {}]  }
   0x1   :  { %13 = vsyncpa [#allocation6], 0 }
   0x2   :  { %14 = vsyncpa [#allocation9], 0 }
   0x3   :  { %15 = vsyncpa [#allocation4], 0  ;;  %s634_s24 = smov [#allocation5]   ;;  %s516_s28 = scalar_lea.hbm %s786_s1, 256 }
   0x4   :  { %s31_s25 = sshll.u32 %s634_s24, 4  ;;  %p517_p0 = scmp.ne.s32.totalorder %s786_s1, %s516_s28  ;;  %s32_s25 = int_to_ptr.vmem [resolvable:$true] %s31_s25 }
   0x5   :  { %p520_p1 = scmp.lt.u32.totalorder %s516_s28, %s786_s1 }
   0x7   :  { %p522_p2 = pnand %p520_p1, %p517_p0 }
   0x9   :  { %525 = shalt.err (!%p522_p2)
}
   0xa   :  { %s526_s10 = scalar_lea.vmem %s32_s25, 256  ;;  %p531_p4 = scmp.lt.s32.totalorder %s32_s25, %s32_s25 }
   0xb   :  { %p527_p3 = scmp.ne.s32.totalorder %s32_s25, %s526_s10  ;;  %p532_p5 = scmp.lt.s32.totalorder %s526_s10, %s526_s10 }
   0xd   :  { %p533_p6 = por %p532_p5, %p531_p4 }
   0xf   :  { %p534_p7 = pnand %p533_p6, %p527_p3 }
  0x11   :  { %537 = shalt.err (!%p534_p7)
}
  0x12   :  { %s635_s11 = smov 64   ;;  %s636_s12 = smov 4  }
  0x13   :  { %37 = dma.hbm_to_vmem [thread:$0]  %s786_s1, 256, %s32_s25, [#allocation6], %s635_s11, %s635_s11, %s636_s12  }
  0x14   :  { %s637_s15 = smov [#allocation2]   ;;  %s638_s17 = smov [#allocation7]  }
  0x15   :  { %s22_s16 = sshll.u32 %s637_s15, 4  ;;  %s45_s18 = sshll.u32 %s638_s17, 4  ;;  %s23_s16 = int_to_ptr.vmem [resolvable:$true] %s22_s16  ;;  %s46_s18 = int_to_ptr.vmem [resolvable:$true] %s45_s18 }
  0x16   :  { %s538_s21 = scalar_lea.hbm %s785_s0, 128 }
  0x17   :  { %p539_p8 = scmp.ne.s32.totalorder %s785_s0, %s538_s21  ;;  %p542_p9 = scmp.lt.u32.totalorder %s538_s21, %s785_s0 }
  0x19   :  { %p544_p10 = pnand %p542_p9, %p539_p8 }
  0x1b   :  { %547 = shalt.err (!%p544_p10)
}
  0x1c   :  { %s548_s1 = scalar_lea.vmem %s23_s16, 128  ;;  %p553_p12 = scmp.lt.s32.totalorder %s23_s16, %s23_s16 }
  0x1d   :  { %p549_p11 = scmp.ne.s32.totalorder %s23_s16, %s548_s1  ;;  %p554_p13 = scmp.lt.s32.totalorder %s548_s1, %s548_s1 }
  0x1f   :  { %p555_p0 = por %p554_p13, %p553_p12 }
  0x21   :  { %p556_p1 = pnand %p555_p0, %p549_p11 }
  0x23   :  { %559 = shalt.err (!%p556_p1)
}
  0x24   :  { %25 = dma.hbm_to_vmem [thread:$0]  %s785_s0, 128, %s23_s16, [#allocation3]  }
  0x25   :  { %s560_s30 = scalar_lea.hbm %s788_s3, 1024 }
  0x26   :  { %p561_p2 = scmp.ne.s32.totalorder %s788_s3, %s560_s30  ;;  %p564_p3 = scmp.lt.u32.totalorder %s560_s30, %s788_s3 }
  0x28   :  { %p566_p4 = pnand %p564_p3, %p561_p2 }
  0x2a   :  { %569 = shalt.err (!%p566_p4)
}
  0x2b   :  { %s570_s14 = scalar_lea.vmem %s46_s18, 1024  ;;  %p575_p6 = scmp.lt.s32.totalorder %s46_s18, %s46_s18 }
  0x2c   :  { %p571_p5 = scmp.ne.s32.totalorder %s46_s18, %s570_s14  ;;  %p576_p7 = scmp.lt.s32.totalorder %s570_s14, %s570_s14 }
  0x2e   :  { %p577_p8 = por %p576_p7, %p575_p6 }
  0x30   :  { %p578_p9 = pnand %p577_p8, %p571_p5 }
  0x32   :  { %581 = shalt.err (!%p578_p9)
}
  0x33   :  { %51 = dma.hbm_to_vmem [thread:$0]  %s788_s3, 1024, %s46_s18, [#allocation6], %s635_s11, %s635_s11, %s636_s12  }
  0x34   :  { %s639_s16 = smov [#allocation8]   ;;  %s582_s21 = scalar_lea.hbm %s790_s5, 1024 }
  0x35   :  { %s59_s17 = sshll.u32 %s639_s16, 4  ;;  %p583_p10 = scmp.ne.s32.totalorder %s790_s5, %s582_s21  ;;  %s60_s17 = int_to_ptr.vmem [resolvable:$true] %s59_s17 }
  0x36   :  { %p586_p11 = scmp.lt.u32.totalorder %s582_s21, %s790_s5 }
  0x38   :  { %p588_p12 = pnand %p586_p11, %p583_p10 }
  0x3a   :  { %591 = shalt.err (!%p588_p12)
}
  0x3b   :  { %s592_s1 = scalar_lea.vmem %s60_s17, 1024  ;;  %p597_p0 = scmp.lt.s32.totalorder %s60_s17, %s60_s17 }
  0x3c   :  { %p593_p13 = scmp.ne.s32.totalorder %s60_s17, %s592_s1  ;;  %p598_p1 = scmp.lt.s32.totalorder %s592_s1, %s592_s1 }
  0x3e   :  { %p599_p2 = por %p598_p1, %p597_p0 }
  0x40   :  { %p600_p3 = pnand %p599_p2, %p593_p13 }
  0x42   :  { %603 = shalt.err (!%p600_p3)
}
  0x43   :  { %65 = dma.hbm_to_vmem [thread:$0]  %s790_s5, 1024, %s60_s17, [#allocation9], %s635_s11, %s635_s11, %s636_s12  }
  0x44   :  { %626 = dma.done.wait [#allocation3], 128  }
  0x45   :  { %627 = vsyncadd [#allocation3], 4294967168 }
  0x46   :  { %628 = dma.done.wait [#allocation6], 1280  }
  0x47   :  { %629 = vsyncadd [#allocation6], 4294966016 }
  0x48   :  { %630 = dma.done.wait [#allocation9], 1024  }
  0x49   :  { %631 = vsyncadd [#allocation9], 4294966272  ;;  %v640_v0 = vmov 0.0   ;;  %vm641_vm0 = vmmov 0   ;;  %v494_v1 = vld [vmem:[#allocation5] sm:$0xff]   ;;  %v495_v2 = vld [vmem:[#allocation5 + $0x8] sm:$0xff]  }
  0x4a   :  { %437 = vmatprep.subr.bf16.mxu0 %v640_v0  ;;  %441 = vmatprep.mubr.msk.bf16.mxu0 %vm641_vm0, %v640_v0  ;;  %v81_v3 = vld [vmem:[#allocation2] sm:$0xff]  ;;  %v496_v4 = vld [vmem:[#allocation7] sm:$0xff]   ;;  %vm106_vm1 = vcmask 261120   ;;  %v498_v7 = vld [vmem:[#allocation7 + $0x10] sm:$0xff]   ;;  %s642_s28 = smov [#allocation10]  }
  0x4b   :  { %445 = vmatprep.subr.bf16.mxu1 %v640_v0  ;;  %461 = vmatprep.mubr.msk.bf16.mxu1 %vm641_vm0, %v640_v0  ;;  %v82_v5 = vpack.c.bf16 %v81_v3, %v81_v3  ;;  %v497_v6 = vld [vmem:[#allocation7 + $0x8] sm:$0xff]   ;;  %v499_v8 = vld [vmem:[#allocation7 + $0x18] sm:$0xff]   ;;  %v500_v9 = vld [vmem:[#allocation7 + $0x20] sm:$0xff]   ;;  %s383_s29 = sshll.u32 %s642_s28, 4  ;;  %s384_s29 = int_to_ptr.vmem [resolvable:$true] %s383_s29 }
  0x4c   :  { %438 = vmatpush3.bf16.msra.mxu0 %v494_v1  ;;  %446 = vmatpush3.bf16.msra.mxu1 %v496_v4  ;;  %v501_v10 = vld [vmem:[#allocation7 + $0x28] sm:$0xff]   ;;  %v502_v11 = vld [vmem:[#allocation7 + $0x30] sm:$0xff]   ;;  %v503_v12 = vld [vmem:[#allocation7 + $0x38] sm:$0xff]   ;;  %p609_p5 = scmp.lt.s32.totalorder %s384_s29, %s384_s29 }
  0x4d   :  { %439 = vmatprep.subr.bf16.mxu0 %v640_v0  ;;  %447 = vmatprep.subr.bf16.mxu1 %v640_v0  ;;  %v504_v13 = vld [vmem:[#allocation8] sm:$0xff]   ;;  %v505_v14 = vld [vmem:[#allocation8 + $0x8] sm:$0xff]   ;;  %v506_v15 = vld [vmem:[#allocation8 + $0x10] sm:$0xff]  }
  0x4e   :  { %v507_v16 = vld [vmem:[#allocation8 + $0x18] sm:$0xff]   ;;  %v394_v17 = vld [vmem:[%s787_s2] ss:$0 sm:$0xff]  ;;  %v508_v25 = vld [vmem:[#allocation8 + $0x20] sm:$0xff]  }
  0x4f   :  { %v509_v26 = vld [vmem:[#allocation8 + $0x28] sm:$0xff]   ;;  %v510_v27 = vld [vmem:[#allocation8 + $0x30] sm:$0xff]   ;;  %v511_v28 = vld [vmem:[#allocation8 + $0x38] sm:$0xff]  }
  0x50   :  { %440 = vmatpush3.bf16.msra.mxu0 %v495_v2  ;;  %448 = vmatpush3.bf16.msra.mxu1 %v497_v6  ;;  %v398_v29 = vld [vmem:[%s789_s4] ss:$0 sm:$0xff]  ;;  %s604_s4 = scalar_lea.vmem %s384_s29, 128 }
  0x51   :  { %465 = vmatprep.subr.bf16.mxu0 %v640_v0  ;;  %449 = vmatprep.subr.bf16.mxu1 %v640_v0  ;;  %v407_v37 = vld [vmem:[%s791_s6] ss:$0 sm:$0xff]  ;;  %p605_p4 = scmp.ne.s32.totalorder %s384_s29, %s604_s4  ;;  %p610_p6 = scmp.lt.s32.totalorder %s604_s4, %s604_s4 }
  0x53   :  { %442 = vmatmul.mubr.msk.bf16.vlgmr.msra.gmra.mrb[0].mxu0 %vm106_vm1, %v82_v5  ;;  %p611_p7 = por %p610_p6, %p609_p5 }
  0x54   :  { %481 = vmatprep.mubr.msk.bf16.mxu0 %vm641_vm0, %v640_v0  ;;  %450 = vmatpush3.bf16.msra.mxu1 %v498_v7 }
  0x55   :  { %451 = vmatprep.subr.bf16.mxu1 %v640_v0  ;;  %466 = vmatpush3.bf16.msra.mxu0 %v504_v13  ;;  %p612_p8 = pnand %p611_p7, %p605_p4 }
  0x56   :  { %467 = vmatprep.subr.bf16.mxu0 %v640_v0 }
  0x58   :  { %452 = vmatpush3.bf16.msra.mxu1 %v499_v8 }
  0x59   :  { %453 = vmatprep.subr.bf16.mxu1 %v640_v0  ;;  %468 = vmatpush3.bf16.msra.mxu0 %v505_v14 }
  0x5a   :  { %469 = vmatprep.subr.bf16.mxu0 %v640_v0 }
  0x5c   :  { %454 = vmatpush3.bf16.msra.mxu1 %v500_v9 }
  0x5d   :  { %455 = vmatprep.subr.bf16.mxu1 %v640_v0  ;;  %470 = vmatpush3.bf16.msra.mxu0 %v506_v15 }
  0x5e   :  { %471 = vmatprep.subr.bf16.mxu0 %v640_v0 }
  0x60   :  { %456 = vmatpush3.bf16.msra.mxu1 %v501_v10 }
  0x61   :  { %457 = vmatprep.subr.bf16.mxu1 %v640_v0  ;;  %472 = vmatpush3.bf16.msra.mxu0 %v507_v16 }
  0x62   :  { %473 = vmatprep.subr.bf16.mxu0 %v640_v0 }
  0x64   :  { %458 = vmatpush3.bf16.msra.mxu1 %v502_v11 }
  0x65   :  { %459 = vmatprep.subr.bf16.mxu1 %v640_v0  ;;  %474 = vmatpush3.bf16.msra.mxu0 %v508_v25 }
  0x66   :  { %475 = vmatprep.subr.bf16.mxu0 %v640_v0 }
  0x68   :  { %460 = vmatpush3.bf16.msra.mxu1 %v503_v12 }
  0x69   :  { %476 = vmatpush3.bf16.msra.mxu0 %v509_v26 }
  0x6a   :  { %477 = vmatprep.subr.bf16.mxu0 %v640_v0 }
  0x6d   :  { %478 = vmatpush3.bf16.msra.mxu0 %v510_v27 }
  0x6e   :  { %479 = vmatprep.subr.bf16.mxu0 %v640_v0 }
  0x71   :  { %480 = vmatpush3.bf16.msra.mxu0 %v511_v28 }
 0x126   :  { %v144_v18 = vpop.f32.mrb[0].mxu0 }
 0x127   :  { %v145_v19 = vadd.f32 %v394_v17, %v144_v18  ;;  %v443_v20 = vpop.f32.mrb[1].mxu0 }
 0x128   :  { %v147_v21 = vpop.f32.mrb[2].mxu0 }
 0x129   :  { %512 = vtanh.f32 %v145_v19  ;;  %v444_v22 = vpop.f32.mrb[3].mxu0 }
 0x133   :  { %v513_v23 = vpop.eup %512 }
 0x134   :  { %v151_v24 = vpack.c.bf16 %v513_v23, %v513_v23 }
 0x136   :  { %462 = vmatmul.mubr.bf16.vlgmr.msra.gmra.mrb[0].mxu1 %v151_v24 }
 0x209   :  { %v257_v30 = vpop.f32.mrb[0].mxu1 }
 0x20a   :  { %v258_v31 = vadd.f32 %v398_v29, %v257_v30  ;;  %v463_v32 = vpop.f32.mrb[1].mxu1 }
 0x20b   :  { %v260_v33 = vpop.f32.mrb[2].mxu1 }
 0x20c   :  { %514 = vtanh.f32 %v258_v31  ;;  %v464_v34 = vpop.f32.mrb[3].mxu1 }
 0x216   :  { %v515_v35 = vpop.eup %514 }
 0x217   :  { %v264_v36 = vpack.c.bf16 %v515_v35, %v515_v35 }
 0x219   :  { %482 = vmatmul.mubr.bf16.vlgmr.msra.gmra.mrb[4].mxu0 %v264_v36 }
 0x2ec   :  { %v370_v38 = vpop.f32.mrb[4].mxu0 }
 0x2ed   :  { %v371_v39 = vadd.f32 %v407_v37, %v370_v38  ;;  %v483_v40 = vpop.f32.mrb[5].mxu0 }
 0x2ee   :  { %v373_v41 = vpop.f32.mrb[6].mxu0 }
 0x2ef   :  { %376 = vst [vmem:[#allocation10] sm:$0xff] %v371_v39  ;;  %v484_v42 = vpop.f32.mrb[7].mxu0 }
 0x2f0   :  { %615 = shalt.err (!%p612_p8)
}
 0x2f1   :  { %s616_s6 = scalar_lea.hbm %s792_s7, 128 }
 0x2f2   :  { %p617_p9 = scmp.ne.s32.totalorder %s792_s7, %s616_s6  ;;  %p620_p10 = scmp.lt.u32.totalorder %s616_s6, %s792_s7 }
 0x2f4   :  { %p622_p11 = pnand %p620_p10, %p617_p9 }
 0x2f6   :  { %625 = shalt.err (!%p622_p11)
}
 0x2f7   :  { %386 = dma.vmem_to_hbm [thread:$0]  %s384_s29, 128, %s792_s7, [#allocation4]  }
 0x2f8   :  { %632 = dma.done.wait [#allocation4], 128  }
 0x2f9   :  { %633 = vsyncadd [#allocation4], 4294967168 }
 0x2fa   :  { %390 = vsyncpa [#allocation3], 1 }
 0x2fb   :  { %391 = vsyncpa [#allocation6], 1 }
 0x2fc   :  { %392 = vsyncpa [#allocation9], 1 }
 0x2fd   :  { %393 = vsyncpa [#allocation4], 1 }

</bundles_post_ra>
